<compile_context>
chip_gen: v7x
topology: tpu7x:2x2x1
jax: 0.10.0
libtpu: 0.0.40
codegen_flags: <defaults>
</compile_context>

<pallas_src>
import functools

import jax
import jax.numpy as jnp
from jax.experimental import pallas as pl
from jax.experimental.pallas import tpu as pltpu


def _head_kernel(x_ref, w_ref, b_ref, o_ref):
    # x_ref: (TB, C, HW)  raw NCHW activations, spatial flattened on lanes
    # w_ref: (C, NCp)     fully-folded head weight (incl. 1/HW of the mean)
    # b_ref: (1, NCp)     fully-folded head bias
    # o_ref: (TB, NCp)
    pooled = jnp.sum(x_ref[...], axis=2)                      # (TB, C) XLU reduce
    out = jnp.dot(pooled, w_ref[...],
                  preferred_element_type=jnp.float32) + b_ref[...]
    o_ref[...] = out.astype(o_ref.dtype)


def _pick_batch_tile(B, C, HW, bytes_per_elem=4, target_bytes=4 << 20):
    """Per-buffer x tile of a few MiB; 2x double-buffer stays well under the
    v5e 16 MiB scoped-VMEM default (and v6e/v7x 32 MiB)."""
    tb = max(1, target_bytes // (C * HW * bytes_per_elem))
    if tb >= B:
        return B
    # Multiple of 8 keeps the (TB, NCp) output block sublane-aligned.
    return max(8, (tb // 8) * 8)


def backbone_based_model_forward(x_nchw, params):
    """x_nchw: [B, C, H, W] float32. Returns [B, num_classes]."""
    B, C, H, W = x_nchw.shape
    HW = H * W
    num_classes = params["wl"].shape[1]
    ncp = ((num_classes + 127) // 128) * 128                  # lane-dense output

    # Backbone == identity (see TODO above). NCHW -> (B, C, HW) is a free view.
    x3d = x_nchw.reshape(B, C, HW)

    # Trace-time exact fold of conv + BN + linear (+ 1/HW of the mean).
    eps = 1e-5
    inv_std = 1.0 / jnp.sqrt(params["bn_var"] + eps)
    scale = params["bn_gamma"] * inv_std                      # (C,)
    shift = params["bn_beta"] - params["bn_mean"] * scale     # (C,)
    w_fused = ((params["wc"] * scale[None, :]) @ params["wl"]) / HW      # (C, NC)
    b_fused = (params["bc"] * scale[None, :] + shift[None, :]) @ params["wl"] \
        + params["bl"]                                        # (1, NC)

    # Zero-pad num_classes to a multiple of 128 -> unmasked lane-dense stores.
    w_pad = jnp.zeros((C, ncp), jnp.float32).at[:, :num_classes].set(w_fused)
    b_pad = jnp.zeros((1, ncp), jnp.float32).at[:, :num_classes].set(b_fused)

    tb = _pick_batch_tile(B, C, HW)
    grid = (pl.cdiv(B, tb),)

    cost = pl.CostEstimate(
        flops=B * C * HW + 2 * B * C * ncp,
        bytes_accessed=4 * (B * C * HW + C * ncp + B * ncp),
        transcendentals=0,
    )

    out_padded = pl.pallas_call(
        _head_kernel,
        out_shape=jax.ShapeDtypeStruct((B, ncp), jnp.float32),
        grid=grid,
        in_specs=[
            pl.BlockSpec((tb, C, HW), lambda i: (i, 0, 0)),   # activations, tiled on B
            pl.BlockSpec((C, ncp), lambda i: (0, 0)),         # fused weight, resident
            pl.BlockSpec((1, ncp), lambda i: (0, 0)),         # fused bias, resident
        ],
        out_specs=pl.BlockSpec((tb, ncp), lambda i: (i, 0)),
        compiler_params=pltpu.CompilerParams(
            dimension_semantics=("parallel",)),
        cost_estimate=cost,
    )(x3d, w_pad, b_pad)

    return out_padded[:, :num_classes]


def make_params(key, channels, num_classes):
    ks = jax.random.split(key, 6)
    # NOTE: wc is (C_in, C_out) — transposed relative to PyTorch Conv2d's
    # (C_out, C_in, 1, 1); real checkpoints must be transposed on load.
    wc = jax.random.normal(ks[0], (channels, channels), jnp.float32) * 0.05
    bc = jax.random.normal(ks[1], (1, channels), jnp.float32) * 0.05
    bn_gamma = 1.0 + 0.1 * jax.random.normal(ks[2], (channels,), jnp.float32)
    bn_beta = 0.1 * jax.random.normal(ks[3], (channels,), jnp.float32)
    bn_mean = 0.05 * jax.random.normal(ks[4], (channels,), jnp.float32)
    bn_var = jnp.abs(1.0 + 0.1 * jax.random.normal(ks[5], (channels,), jnp.float32))
    wl = jax.random.normal(jax.random.fold_in(key, 7),
                           (channels, num_classes), jnp.float32) * 0.05   # (in, out)
    bl = jax.random.normal(jax.random.fold_in(key, 8),
                           (1, num_classes), jnp.float32) * 0.05
    return dict(wc=wc, bc=bc, bn_gamma=bn_gamma, bn_beta=bn_beta,
                bn_mean=bn_mean, bn_var=bn_var, wl=wl, bl=bl)


if __name__ == "__main__":
    key = jax.random.PRNGKey(0)
    B, C, H, W = 2, 32, 16, 16        # backbone_output_channel = 32, HW = 256 (lane-dense)
    NUM_CLASSES = 16

    kx, kp = jax.random.split(key)
    x = jax.random.normal(kx, (B, C, H, W), jnp.float32)
    params = make_params(kp, C, NUM_CLASSES)

    fwd = jax.jit(functools.partial(backbone_based_model_forward, params=params))
    out = jax.block_until_ready(fwd(x))
    assert out.shape == (B, NUM_CLASSES), out.shape

    # Pure-JAX reference: un-fused conv -> BN -> pool -> linear (original order).
    def ref(x_nchw):
        xt = jnp.transpose(x_nchw, (0, 2, 3, 1)).reshape(B, H * W, C)
        y = xt @ params["wc"] + params["bc"]
        inv_std = 1.0 / jnp.sqrt(params["bn_var"] + 1e-5)
        y = (y - params["bn_mean"]) * (params["bn_gamma"] * inv_std) + params["bn_beta"]
        pooled = jnp.mean(y, axis=1)                      # (B, C)
        return pooled @ params["wl"] + params["bl"]

    ref_out = ref(x)
    assert jnp.allclose(out, ref_out, atol=1e-4, rtol=1e-4), \
        float(jnp.max(jnp.abs(out - ref_out)))
    print("KERNEL_OK")
</pallas_src>

<mosaic_0001>
module attributes {stable_mosaic.version = 11 : i64} {
  func.func @_head_kernel(%arg0: i32, %arg1: memref<2x32x256xf32, #tpu.memory_space<vmem>>, %arg2: memref<32x128xf32, #tpu.memory_space<vmem>>, %arg3: memref<1x128xf32, #tpu.memory_space<vmem>>, %arg4: memref<2x128xf32, #tpu.memory_space<vmem>>) attributes {dimension_semantics = [#tpu.dimension_semantics<parallel>], iteration_bounds = array<i64: 1>, scalar_prefetch = 0 : i64, scratch_operands = 0 : i64, tpu.core_type = #tpu.core_type<tc>, window_params = [{transform_indices = @transform_0, window_bounds = array<i64: 2, 32, 256>}, {pipeline_mode = #tpu.pipeline_mode<synchronous>, transform_indices = @transform_1, window_bounds = array<i64: 32, 128>}, {pipeline_mode = #tpu.pipeline_mode<synchronous>, transform_indices = @transform_2, window_bounds = array<i64: 1, 128>}, {transform_indices = @transform_3, window_bounds = array<i64: 2, 128>}]} {
    %c0 = arith.constant 0 : index
    %c0_0 = arith.constant 0 : index
    %c0_1 = arith.constant 0 : index
    %0 = vector.load %arg1[%c0, %c0_0, %c0_1] : memref<2x32x256xf32, #tpu.memory_space<vmem>>, vector<2x32x256xf32>
    %cst = arith.constant dense<0.000000e+00> : vector<2x32xf32>
    %1 = vector.multi_reduction <add>, %0, %cst [2] : vector<2x32x256xf32> to vector<2x32xf32>
    %c0_2 = arith.constant 0 : index
    %c0_3 = arith.constant 0 : index
    %2 = vector.load %arg2[%c0_2, %c0_3] : memref<32x128xf32, #tpu.memory_space<vmem>>, vector<32x128xf32>
    %cst_4 = arith.constant dense<0.000000e+00> : vector<2x128xf32>
    %3 = tpu.matmul %1, %2, %cst_4 {dimension_numbers = #tpu.dot_dimension_numbers<[1], [0], [0], [1], [0, 0, 1, 1], [], []>} : vector<2x32xf32>, vector<32x128xf32>, vector<2x128xf32> -> vector<2x128xf32>
    %c0_5 = arith.constant 0 : index
    %c0_6 = arith.constant 0 : index
    %4 = vector.load %arg3[%c0_5, %c0_6] : memref<1x128xf32, #tpu.memory_space<vmem>>, vector<1x128xf32>
    %5 = vector.broadcast %4 : vector<1x128xf32> to vector<2x128xf32>
    %6 = arith.addf %3, %5 : vector<2x128xf32>
    %c0_7 = arith.constant 0 : index
    %c0_8 = arith.constant 0 : index
    %7 = vector.load %arg4[%c0_7, %c0_8] : memref<2x128xf32, #tpu.memory_space<vmem>>, vector<2x128xf32>
    tpu.vector_store %arg4[%c0_7, %c0_8], %6 {strides = array<i32>} : memref<2x128xf32, #tpu.memory_space<vmem>>, vector<2x128xf32>,
    return
  }
  func.func @transform_0(%arg0: i32) -> (i32, i32, i32) {
    %c0_i32 = arith.constant 0 : i32
    %c0_i32_0 = arith.constant 0 : i32
    %c0_i32_1 = arith.constant 0 : i32
    return %arg0, %c0_i32, %c0_i32_0 : i32, i32, i32
  }
  func.func @transform_1(%arg0: i32) -> (i32, i32) {
    %c0_i32 = arith.constant 0 : i32
    %c0_i32_0 = arith.constant 0 : i32
    %c0_i32_1 = arith.constant 0 : i32
    return %c0_i32, %c0_i32_0 : i32, i32
  }
  func.func @transform_2(%arg0: i32) -> (i32, i32) {
    %c0_i32 = arith.constant 0 : i32
    %c0_i32_0 = arith.constant 0 : i32
    %c0_i32_1 = arith.constant 0 : i32
    return %c0_i32, %c0_i32_0 : i32, i32
  }
  func.func @transform_3(%arg0: i32) -> (i32, i32) {
    %c0_i32 = arith.constant 0 : i32
    %c0_i32_0 = arith.constant 0 : i32
    return %arg0, %c0_i32 : i32, i32
  }
}

</mosaic_0001>

<bundles_post_ra>
// kernel: backbone_based_model_forward.1
= control target key start
LH: loop header
LB: loop body
LE: loop exit
PB: predicated region body
PF: predicated region fallthrough
CT: control target
= control target key end

     0   :  { %s361_s0 = inlined_call_operand.vmem [shape: f32[2,32,256], index: 0, kind: input, shape index: {}]   ;;  %s362_s1 = inlined_call_operand.vmem [shape: f32[32,128], index: 1, kind: input, shape index: {}]   ;;  %s363_s2 = inlined_call_operand.vmem [shape: f32[1,128], index: 2, kind: input, shape index: {}]   ;;  %s364_s3 = inlined_call_operand.hbm [shape: f32[2,128], index: 3, kind: output, shape index: {}]  }
   0x1   :  { %v23_v0 = vld [vmem:[%s361_s0 + $0x40] sm:$0xff]  ;;  %v24_v1 = vld [vmem:[%s361_s0 + $0x48] sm:$0xff]  ;;  %v25_v5 = vld [vmem:[%s361_s0 + $0x50] sm:$0xff] }
   0x2   :  { %v15_v2 = vld [vmem:[%s361_s0] sm:$0xff]  ;;  %v43_v3 = vadd.f32 %v24_v1, %v23_v0  ;;  %v16_v4 = vld [vmem:[%s361_s0 + $0x8] sm:$0xff]  ;;  %v26_v6 = vld [vmem:[%s361_s0 + $0x58] sm:$0xff] }
   0x3   :  { %v31_v7 = vadd.f32 %v16_v4, %v15_v2  ;;  %v17_v8 = vld [vmem:[%s361_s0 + $0x10] sm:$0xff]  ;;  %v18_v9 = vld [vmem:[%s361_s0 + $0x18] sm:$0xff]  ;;  %v46_v10 = vadd.f32 %v26_v6, %v25_v5  ;;  %v27_v12 = vld [vmem:[%s361_s0 + $0x60] sm:$0xff] }
   0x4   :  { %44 = vadd.xlane.f32.xlu1 %v43_v3  ;;  %v34_v11 = vadd.f32 %v18_v9, %v17_v8  ;;  %v28_v13 = vld [vmem:[%s361_s0 + $0x68] sm:$0xff]  ;;  %v19_v14 = vld [vmem:[%s361_s0 + $0x20] sm:$0xff] }
   0x5   :  { %32 = vadd.xlane.f32.xlu0 %v31_v7  ;;  %v20_v15 = vld [vmem:[%s361_s0 + $0x28] sm:$0xff] }
   0x6   :  { %8 = vsyncpa [#allocation3], 0  ;;  %v49_v16 = vadd.f32 %v28_v13, %v27_v12  ;;  %v37_v17 = vadd.f32 %v20_v15, %v19_v14  ;;  %v29_v18 = vld [vmem:[%s361_s0 + $0x70] sm:$0xff]  ;;  %v30_v19 = vld [vmem:[%s361_s0 + $0x78] sm:$0xff]  ;;  %v262_v27 = vmov 0.0|0.0   ;;  %vm263_vm0 = vmmov 0  }
   0x7   :  { %v21_v20 = vld [vmem:[%s361_s0 + $0x30] sm:$0xff]  ;;  %v22_v21 = vld [vmem:[%s361_s0 + $0x38] sm:$0xff]  ;;  %v52_v22 = vadd.f32 %v30_v19, %v29_v18  ;;  %v55_v24 = vld [vmem:[%s362_s1] sm:$0xff]  ;;  %228 = vmatprep.subr.bf16.mxu0 %v262_v27  ;;  %v264_v31 = vmov 0.0   ;;  %v74_v32 = vlaneseq  ;;  %vm85_vm1 = vcmask 130112   ;;  %s265_s25 = smov [#allocation2]  }
   0x8   :  { %47 = vadd.xlane.f32.xlu1 %v46_v10  ;;  %v40_v23 = vadd.f32 %v22_v21, %v21_v20  ;;  %v56_v25 = vld [vmem:[%s362_s1 + $0x8] sm:$0xff]  ;;  %v57_v28 = vld [vmem:[%s362_s1 + $0x10] sm:$0xff]  ;;  %v58_v29 = vld [vmem:[%s362_s1 + $0x18] sm:$0xff]  ;;  %225 = vmatprep.mubr.msk.f32.mxu0 %vm263_vm0, %v264_v31  ;;  %vm92_vm2 = vcmask 195712   ;;  %vm99_vm3 = vcmask 261312   ;;  %vm120_vm4 = vcmask 1041409  }
   0x9   :  { %35 = vadd.xlane.f32.xlu0 %v34_v11  ;;  %v229_v26 = vpack.c.bf16 %v56_v25, %v55_v24  ;;  %v232_v30 = vpack.c.bf16 %v58_v29, %v57_v28  ;;  %v75_v33 = vand.u32 127, %v74_v32  ;;  %v77_v38 = vshrl.u32 %v74_v32, 7  ;;  %v210_v1 = vld [vmem:[%s363_s2] ss:$0 sm:$0xff]  ;;  %s202_s26 = sshll.u32 %s265_s25, 4  ;;  %s203_s26 = int_to_ptr.vmem [resolvable:$true] %s202_s26 }
   0xa   :  { %vm122_vm5 = vcmask 261120   ;;  %s238_s27 = scalar_lea.vmem %s203_s26, 32  ;;  %p243_p1 = scmp.lt.s32.totalorder %s203_s26, %s203_s26 }
   0xb   :  { %230 = vmatpush3.bf16.msra.mxu0 %v229_v26  ;;  %v80_v36 = vadd.s32 4294967288, %v75_v33  ;;  %v87_v37 = vadd.s32 4294967280, %v75_v33  ;;  %v94_v42 = vadd.s32 4294967272, %v75_v33  ;;  %v78_v44 = vsub.s32 %v75_v33, %v77_v38  ;;  %p239_p0 = scmp.ne.s32.totalorder %s203_s26, %s238_s27  ;;  %p244_p2 = scmp.lt.s32.totalorder %s238_s27, %s238_s27 }
   0xc   :  { %50 = vadd.xlane.f32.xlu1 %v49_v16  ;;  %231 = vmatprep.subr.bf16.mxu0 %v262_v27 }
   0xd   :  { %38 = vadd.xlane.f32.xlu0 %v37_v17  ;;  %v83_v40 = vsub.s32 %v80_v36, %v77_v38  ;;  %v90_v43 = vsub.s32 %v87_v37, %v77_v38  ;;  %v97_v48 = vsub.s32 %v94_v42, %v77_v38  ;;  %p245_p3 = por %p244_p2, %p243_p1 }
   0xf   :  { %233 = vmatpush3.bf16.msra.mxu0 %v232_v30  ;;  %p246_p4 = pnand %p245_p3, %p239_p0 }
  0x10   :  { %53 = vadd.xlane.f32.xlu1 %v52_v22 }
  0x11   :  { %41 = vadd.xlane.f32.xlu0 %v40_v23 }
  0x91   :  { %v45_v34 = vpop.xlane.xlu1 %44 }
  0x92   :  { %v33_v35 = vpop.xlane.xlu0 %32  ;;  %v104_v51 = vrot.slane %v45_v34, %v78_v44 }
  0x93   :  { %v79_v53 = vrot.slane %v33_v35, %v78_v44 }
  0x95   :  { %v48_v39 = vpop.xlane.xlu1 %47 }
  0x96   :  { %v36_v41 = vpop.xlane.xlu0 %35  ;;  %v108_v46 = vrot.slane %v48_v39, %v83_v40 }
  0x97   :  { %v84_v49 = vrot.slane %v36_v41, %v83_v40 }
  0x98   :  { %v109_v55 = vsel %vm85_vm1, %v108_v46, %v104_v51 }
  0x99   :  { %v51_v45 = vpop.xlane.xlu1 %50  ;;  %v86_v58 = vsel %vm85_vm1, %v84_v49, %v79_v53 }
  0x9a   :  { %v39_v47 = vpop.xlane.xlu0 %38  ;;  %v113_v50 = vrot.slane %v51_v45, %v90_v43 }
  0x9b   :  { %v91_v52 = vrot.slane %v39_v47, %v90_v43 }
  0x9c   :  { %v114_v59 = vsel %vm92_vm2, %v113_v50, %v109_v55 }
  0x9d   :  { %v54_v54 = vpop.xlane.xlu1 %53  ;;  %v93_v61 = vsel %vm92_vm2, %v91_v52, %v86_v58 }
  0x9e   :  { %v118_v56 = vrot.slane %v54_v54, %v97_v48  ;;  %v42_v57 = vpop.xlane.xlu0 %41 }
  0x9f   :  { %v98_v60 = vrot.slane %v42_v57, %v97_v48 }
  0xa0   :  { %v119_v62 = vsel %vm99_vm3, %v118_v56, %v114_v59 }
  0xa1   :  { %v100_v63 = vsel %vm99_vm3, %v98_v60, %v93_v61 }
  0xa2   :  { %v121_v0 = vsel %vm120_vm4, %v119_v62, %v100_v63 }
  0xa3   :  { %226 = vmatmul.mubr.msk.f32.vlgmr.msra.gmra.mrb[0].mxu0 %vm122_vm5, %v121_v0 }
 0x176   :  { %v191_v2 = vpop.f32.mrb[0].mxu0 }
 0x177   :  { %v192_v3 = vadd.f32 %v210_v1, %v191_v2  ;;  %v227_v4 = vpop.f32.mrb[1].mxu0 }
 0x179   :  { %195 = vst [vmem:[#allocation2] sm:$0x3] %v192_v3 }
 0x17a   :  { %249 = shalt.err (!%p246_p4)
}
 0x17b   :  { %s250_s30 = scalar_lea.hbm %s364_s3, 32 }
 0x17c   :  { %p251_p5 = scmp.ne.s32.totalorder %s364_s3, %s250_s30  ;;  %p254_p6 = scmp.lt.u32.totalorder %s250_s30, %s364_s3 }
 0x17e   :  { %p256_p7 = pnand %p254_p6, %p251_p5 }
 0x180   :  { %259 = shalt.err (!%p256_p7)
}
 0x181   :  { %205 = dma.vmem_to_hbm [thread:$0]  %s203_s26, 32, %s364_s3, [#allocation3]  }
 0x182   :  { %260 = dma.done.wait [#allocation3], 32  }
 0x183   :  { %261 = vsyncadd [#allocation3], 4294967264 }
 0x184   :  { %209 = vsyncpa [#allocation3], 1 }

</bundles_post_ra>
